<compile_context>
chip_gen: v6e
topology: v6e:2x2x1
jax: 0.10.0
libtpu: 0.0.40
codegen_flags: <defaults>
</compile_context>

<pallas_src>
import jax
import jax.numpy as jnp
from jax.experimental import pallas as pl
from jax.experimental.pallas import tpu as pltpu

INPUT_SIZE = 28 * 28   # 784
NUM_CLASSES = 10


def linear_kernel(x_ref, w_ref, b_ref, o_ref):
    # x_ref: [TM, K] bf16   w_ref: [K, NPAD] bf16 (resident)
    # b_ref: [1, NPAD] f32 (resident)            o_ref: [TM, NPAD] f32
    acc = jnp.dot(x_ref[...], w_ref[...], preferred_element_type=jnp.float32)
    o_ref[...] = (acc + b_ref[...]).astype(o_ref.dtype)


def logistic_regression_forward(x, weight, bias, *, tm=None):
    """Forward pass of nn.Linear(input_size, num_classes).

    x:      [B, input_size]            float32 (PyTorch nn.Linear input layout)
    weight: [num_classes, input_size]  float32 (PyTorch nn.Linear weight layout)
    bias:   [num_classes]              float32
    returns [B, num_classes]           float32
    """
    B, K = x.shape
    N, K2 = weight.shape
    assert K == K2, "weight / input feature mismatch"

    # Lane-dense output width (multiple of 128) -> unmasked stores.
    NPAD = 128 * pl.cdiv(N, 128)

    # bf16 inputs (memory-bound kernel); f32 accumulation on the MXU.
    x_bf = x.astype(jnp.bfloat16)
    w_t = jnp.zeros((K, NPAD), jnp.bfloat16).at[:, :N].set(
        weight.T.astype(jnp.bfloat16))
    b_pad = jnp.zeros((1, NPAD), jnp.float32).at[:, :N].set(
        bias.astype(jnp.float32))

    # Batch tile: biggest tile that comfortably fits the smallest scoped-VMEM
    # budget (v5e 16 MiB default). For B < TM use the full batch as one block.
    if tm is None:
        tm = 1024
    tm = min(tm, B)
    grid = (pl.cdiv(B, tm),)

    out_padded = pl.pallas_call(
        linear_kernel,
        out_shape=jax.ShapeDtypeStruct((B, NPAD), jnp.float32),
        grid_spec=pltpu.PrefetchScalarGridSpec(
            num_scalar_prefetch=0,
            grid=grid,
            in_specs=[
                pl.BlockSpec((tm, K), lambda i: (i, 0)),     # x tiles stream
                pl.BlockSpec((K, NPAD), lambda i: (0, 0)),   # W^T resident
                pl.BlockSpec((1, NPAD), lambda i: (0, 0)),   # bias resident
            ],
            out_specs=pl.BlockSpec((tm, NPAD), lambda i: (i, 0)),
        ),
        compiler_params=pltpu.CompilerParams(
            # Batch tiles are independent -> shard across TensorCores on v7x.
            dimension_semantics=("parallel",),
        ),
    )(x_bf, w_t, b_pad)

    return out_padded[:, :N]


if __name__ == "__main__":
    key = jax.random.PRNGKey(0)
    k_x, k_w, k_b = jax.random.split(key, 3)

    # PyTorch nn.Linear default init: U(-1/sqrt(fan_in), 1/sqrt(fan_in))
    bound = 1.0 / (INPUT_SIZE ** 0.5)
    w = jax.random.uniform(k_w, (NUM_CLASSES, INPUT_SIZE), jnp.float32,
                           minval=-bound, maxval=bound)   # PyTorch layout [out, in]
    b = jax.random.uniform(k_b, (NUM_CLASSES,), jnp.float32,
                           minval=-bound, maxval=bound)

    # Multi-tile case: B=256 with TM=128 -> grid=(2,) exercises the pipelined path.
    B = 256
    x = jax.random.normal(k_x, (B, INPUT_SIZE), jnp.float32)
    out = logistic_regression_forward(x, w, b, tm=128)
    out = jax.block_until_ready(out)
    assert out.shape == (B, NUM_CLASSES)

    # Reference matching the kernel's numerics (bf16 inputs, f32 accumulate).
    x_bf = x.astype(jnp.bfloat16).astype(jnp.float32)
    w_bf = w.astype(jnp.bfloat16).astype(jnp.float32)
    ref_bf16 = x_bf @ w_bf.T + b
    assert jnp.allclose(out, ref_bf16, atol=1e-2, rtol=1e-2), "mismatch vs bf16 reference"

    # Sanity vs the full-f32 PyTorch semantics (looser tolerance: bf16 inputs).
    ref_f32 = x @ w.T + b
    assert jnp.allclose(out, ref_f32, atol=5e-2, rtol=5e-2), "mismatch vs f32 reference"

    # Small-batch path: single block covering the full (non-multiple-of-128) batch.
    x_small = x[:8]
    out_small = jax.block_until_ready(logistic_regression_forward(x_small, w, b))
    assert out_small.shape == (8, NUM_CLASSES)
    assert jnp.allclose(out_small, ref_bf16[:8], atol=1e-2, rtol=1e-2), "small-batch mismatch"

    print("KERNEL_OK")
</pallas_src>

<mosaic_0001>
module attributes {stable_mosaic.version = 11 : i64} {
  func.func @linear_kernel(%arg0: i32, %arg1: memref<128x784xbf16, #tpu.memory_space<vmem>>, %arg2: memref<784x128xbf16, #tpu.memory_space<vmem>>, %arg3: memref<1x128xf32, #tpu.memory_space<vmem>>, %arg4: memref<128x128xf32, #tpu.memory_space<vmem>>) attributes {dimension_semantics = [#tpu.dimension_semantics<parallel>], iteration_bounds = array<i64: 2>, scalar_prefetch = 0 : i64, scratch_operands = 0 : i64, tpu.core_type = #tpu.core_type<tc>, window_params = [{transform_indices = @transform_0, window_bounds = array<i64: 128, 784>}, {pipeline_mode = #tpu.pipeline_mode<synchronous>, transform_indices = @transform_1, window_bounds = array<i64: 784, 128>}, {pipeline_mode = #tpu.pipeline_mode<synchronous>, transform_indices = @transform_2, window_bounds = array<i64: 1, 128>}, {transform_indices = @transform_3, window_bounds = array<i64: 128, 128>}]} {
    %c0 = arith.constant 0 : index
    %c0_0 = arith.constant 0 : index
    %0 = vector.load %arg1[%c0, %c0_0] : memref<128x784xbf16, #tpu.memory_space<vmem>>, vector<128x784xbf16>
    %c0_1 = arith.constant 0 : index
    %c0_2 = arith.constant 0 : index
    %1 = vector.load %arg2[%c0_1, %c0_2] : memref<784x128xbf16, #tpu.memory_space<vmem>>, vector<784x128xbf16>
    %cst = arith.constant dense<0.000000e+00> : vector<128x128xf32>
    %2 = tpu.matmul %0, %1, %cst {dimension_numbers = #tpu.dot_dimension_numbers<[1], [0], [0], [1], [0, 0, 1, 1], [], []>} : vector<128x784xbf16>, vector<784x128xbf16>, vector<128x128xf32> -> vector<128x128xf32>
    %c0_3 = arith.constant 0 : index
    %c0_4 = arith.constant 0 : index
    %3 = vector.load %arg3[%c0_3, %c0_4] : memref<1x128xf32, #tpu.memory_space<vmem>>, vector<1x128xf32>
    %4 = vector.broadcast %3 : vector<1x128xf32> to vector<128x128xf32>
    %5 = arith.addf %2, %4 : vector<128x128xf32>
    %c0_5 = arith.constant 0 : index
    %c0_6 = arith.constant 0 : index
    %6 = vector.load %arg4[%c0_5, %c0_6] : memref<128x128xf32, #tpu.memory_space<vmem>>, vector<128x128xf32>
    tpu.vector_store %arg4[%c0_5, %c0_6], %5 {strides = array<i32>} : memref<128x128xf32, #tpu.memory_space<vmem>>, vector<128x128xf32>,
    return
  }
  func.func @transform_0(%arg0: i32) -> (i32, i32) {
    %c0_i32 = arith.constant 0 : i32
    %c0_i32_0 = arith.constant 0 : i32
    return %arg0, %c0_i32 : i32, i32
  }
  func.func @transform_1(%arg0: i32) -> (i32, i32) {
    %c0_i32 = arith.constant 0 : i32
    %c0_i32_0 = arith.constant 0 : i32
    %c0_i32_1 = arith.constant 0 : i32
    return %c0_i32, %c0_i32_0 : i32, i32
  }
  func.func @transform_2(%arg0: i32) -> (i32, i32) {
    %c0_i32 = arith.constant 0 : i32
    %c0_i32_0 = arith.constant 0 : i32
    %c0_i32_1 = arith.constant 0 : i32
    return %c0_i32, %c0_i32_0 : i32, i32
  }
  func.func @transform_3(%arg0: i32) -> (i32, i32) {
    %c0_i32 = arith.constant 0 : i32
    %c0_i32_0 = arith.constant 0 : i32
    return %arg0, %c0_i32 : i32, i32
  }
}

</mosaic_0001>

<bundles_post_ra>
// kernel: tpu_custom_call.1
= control target key start
LH: loop header
LB: loop body
LE: loop exit
PB: predicated region body
PF: predicated region fallthrough
CT: control target
= control target key end

     0   :  { %8 = vsyncpa [#allocation3], 0  ;;  %s2565_s0 = inlined_call_operand.vmem [shape: bf16[256,784], index: 0, kind: input, shape index: {}]   ;;  %s2566_s1 = inlined_call_operand.vmem [shape: bf16[784,128], index: 1, kind: input, shape index: {}]   ;;  %s2567_s2 = inlined_call_operand.vmem [shape: f32[1,128], index: 2, kind: input, shape index: {}]   ;;  %s2568_s3 = inlined_call_operand.hbm [shape: f32[256,128], index: 3, kind: output, shape index: {}]  }
   0x1   :  { %10 = vsyncpa [#allocation3 + $0x1], 0  ;;  %s2042_s12 = smov 0   ;;  %s2044_s13 = smov 0  }
   0x2   :  { %s2046_s14 = smov 0   ;;  %s2048_s15 = smov 0  }
   0x3 LB: > { %s2063_s16 = sadd.s32 4294967295, %s2017_s15   ;;  %s1424_s17 = sadd.s32 4294967294, %s2017_s15   ;;  %s2017_s15 = sphi %s2048_s15, %s2592_s15   ;;  %s2013_s14 = sphi %s2046_s14, %s2591_s14   ;;  %s2009_s13 = sphi %s2044_s13, %s2590_s13   ;;  %s2005_s12 = sphi %s2042_s12, %s2589_s12  }
   0x4   : > { %s2067_s18 = sadd.s32 1, %s2017_s15   ;;  %s91_s19 = sadd.s32 1, %s2013_s14 }
   0x5   : > { %s88_s20 = ssub.s32 %s2017_s15, %s2067_s18  ;;  %p101_p0 = scmp.ne.s32.totalorder %s2013_s14, %s2009_s13 }
   0x6   : > { %p89_p1 = scmp.eq.s32.totalorder %s88_s20, 0  ;;  %p102_p2 = scmp.eq.s32.totalorder %s2063_s16, 1 }
   0x7   : > { %p107_p3 = scmp.ne.s32.totalorder %s2009_s13, %s2005_s12  ;;  %p108_p4 = scmp.eq.s32.totalorder %s1424_s17, 1 }
   0x8   : > { %s2078_s21 = scalar_select %p89_p1, %s2013_s14, %s91_s19  }
   0x9   : > { %p2080_p5 = por %p102_p2, %p101_p0  ;;  %p2084_p6 = por %p108_p4, %p107_p3 }
   0xa   : > { %p1427_p7 = scmp.ge.s32.totalorder %s2017_s15, 1  ;;  %p142_p8 = scmp.lt.s32.totalorder %s2017_s15, 3 }
   0xc   : > { %p143_p9 = pnand %p1427_p7, %p142_p8 }
   0xe   : > { %146 = sbr.rel (%p143_p9) target bundleno = 376 (0x178), region = 32 }
  0x13   : > { %v1828_v0 = vld [vmem:[%s2566_s1 + $0x78] sm:$0xff]   ;;  %v1832_v4 = vld [vmem:[%s2566_s1 + $0x70] sm:$0xff]   ;;  %v1836_v8 = vld [vmem:[%s2566_s1 + $0x68] sm:$0xff]   ;;  %s1429_s9 = sshll.u32 %s2063_s16, 4  ;;  %vm919_vm0 = vcmask 130048   ;;  %s1550_s26 = sshll.u32 %s2063_s16, 11 }
  0x14   : > { %v1829_v1 = vld [vmem:[%s2566_s1 + $0xf8] sm:$0xff]   ;;  %1551 = vmatprep.subr.bf16.mxu0 %v1828_v0  ;;  %v1833_v5 = vld [vmem:[%s2566_s1 + $0xf0] sm:$0xff]   ;;  %v1837_v9 = vld [vmem:[%s2566_s1 + $0xe8] sm:$0xff]   ;;  %p168_p10 = scmp.lt.s32.totalorder %s1429_s9, 31  ;;  %s2518_s30 = scalar_lea.hbm %s2568_s3, %s1550_s26 }
  0x15   : > { %v1830_v2 = vld [vmem:[%s2566_s1 + $0x38] sm:$0xff]   ;;  %1615 = vmatprep.subr.bf16.mxu1 %v1829_v1  ;;  %v1834_v6 = vld [vmem:[%s2566_s1 + $0x30] sm:$0xff]   ;;  %v1838_v10 = vld [vmem:[%s2566_s1 + $0x28] sm:$0xff]   ;;  %s2019_s5 = smov [#allocation2]  }
  0x16   : > { %v1831_v3 = vld [vmem:[%s2566_s1 + $0xb8] sm:$0xff]   ;;  %1552 = vmatpush3.bf16.msra.mxu0 %v1830_v2  ;;  %v1835_v7 = vld [vmem:[%s2566_s1 + $0xb0] sm:$0xff]   ;;  %v1839_v11 = vld [vmem:[%s2566_s1 + $0xa8] sm:$0xff]   ;;  %s2594_s9 = smov (!%p168_p10, %s1429_s9), 31 }
  0x17   : > { %1616 = vmatpush3.bf16.msra.mxu1 %v1831_v3  ;;  %1553 = vmatprep.subr.bf16.mxu0 %v1832_v4  ;;  %v1840_v12 = vld [vmem:[%s2566_s1 + $0x60] sm:$0xff]   ;;  %v1844_v16 = vld [vmem:[%s2566_s1 + $0x58] sm:$0xff]   ;;  %v1848_v20 = vld [vmem:[%s2566_s1 + $0x50] sm:$0xff]   ;;  %s1786_s24 = smul.u32 28, %s2594_s9  ;;  %s1961_s9 = sshll.u32 %s2019_s5, 4  ;;  %s1962_s9 = int_to_ptr.vmem [resolvable:$false] %s1961_s9 }
  0x18   : > { %1617 = vmatprep.subr.bf16.mxu1 %v1833_v5  ;;  %v1841_v13 = vld [vmem:[%s2566_s1 + $0xe0] sm:$0xff]   ;;  %v1845_v17 = vld [vmem:[%s2566_s1 + $0xd8] sm:$0xff]   ;;  %v1849_v21 = vld [vmem:[%s2566_s1 + $0xd0] sm:$0xff]   ;;  %s1963_s6 = scalar_lea.vmem %s1962_s9, 4096 }
  0x19   : > { %v1842_v14 = vld [vmem:[%s2566_s1 + $0x20] sm:$0xff]   ;;  %v1846_v18 = vld [vmem:[%s2566_s1 + $0x18] sm:$0xff]   ;;  %v1850_v22 = vld [vmem:[%s2566_s1 + $0x10] sm:$0xff]   ;;  %s2184_s7 = scalar_lea.vmem %s2565_s0, %s1786_s24 }
  0x1a   : > { %1554 = vmatpush3.bf16.msra.mxu0 %v1834_v6  ;;  %v1843_v15 = vld [vmem:[%s2566_s1 + $0xa0] sm:$0xff]   ;;  %v1847_v19 = vld [vmem:[%s2566_s1 + $0x98] sm:$0xff]   ;;  %v1851_v23 = vld [vmem:[%s2566_s1 + $0x90] sm:$0xff]  }
  0x1b   : > { %1618 = vmatpush3.bf16.msra.mxu1 %v1835_v7  ;;  %1555 = vmatprep.subr.bf16.mxu0 %v1836_v8  ;;  %v1852_v24 = vld [vmem:[%s2566_s1 + $0x48] sm:$0xff]   ;;  %v1856_v28 = vld [vmem:[%s2566_s1 + $0x40] sm:$0xff]   ;;  %v1866_v36 = vld [vmem:[%s2566_s1 + $0x178] sm:$0xff]  }
  0x1c   : > { %1619 = vmatprep.subr.bf16.mxu1 %v1837_v9  ;;  %v1853_v25 = vld [vmem:[%s2566_s1 + $0xc8] sm:$0xff]   ;;  %v1857_v29 = vld [vmem:[%s2566_s1 + $0xc0] sm:$0xff]   ;;  %v1867_v37 = vld [vmem:[%s2566_s1 + $0x138] sm:$0xff]  }
  0x1d   : > { %v1854_v26 = vld [vmem:[%s2566_s1 + $0x8] sm:$0xff]   ;;  %v1858_v30 = vld [vmem:[%s2566_s1] sm:$0xff]   ;;  %v1868_v38 = vld [vmem:[%s2184_s7 + $0x3c] ss:$28 sps:$4 sm:$0xff]  }
  0x1e   : > { %1556 = vmatpush3.bf16.msra.mxu0 %v1838_v10  ;;  %v1855_v27 = vld [vmem:[%s2566_s1 + $0x88] sm:$0xff]   ;;  %v1859_v31 = vld [vmem:[%s2566_s1 + $0x80] sm:$0xff]   ;;  %v1872_v40 = vld [vmem:[%s2184_s7 + $0x38] ss:$28 sps:$4 sm:$0xff]  }
  0x1f   : > { %1620 = vmatpush3.bf16.msra.mxu1 %v1839_v11  ;;  %1557 = vmatprep.subr.bf16.mxu0 %v1840_v12  ;;  %v1860_v32 = vld [vmem:[%s2184_s7] ss:$28 sps:$4 sm:$0xff]   ;;  %v1863_v34 = vld [vmem:[%s2184_s7 + $0x8] ss:$28 sps:$4 sm:$0xff]   ;;  %v1874_v42 = vld [vmem:[%s2566_s1 + $0x170] sm:$0xff]  }
  0x20   : > { %1621 = vmatprep.subr.bf16.mxu1 %v1841_v13  ;;  %v1862_v33 = vld [vmem:[%s2184_s7 + $0x4] ss:$28 sps:$4 sm:$0xff]   ;;  %v1865_v35 = vld [vmem:[%s2184_s7 + $0xc] ss:$28 sps:$4 sm:$0xff]   ;;  %v1875_v43 = vld [vmem:[%s2566_s1 + $0x130] sm:$0xff]  }
  0x21   : > { %976 = vmatprep.mubr.bf16.mxu0 %v1862_v33  ;;  %1073 = vmatprep.mubr.bf16.mxu1 %v1865_v35  ;;  %v1870_v39 = vld [vmem:[%s2184_s7 + $0x44] ss:$28 sps:$4 sm:$0xff]   ;;  %v1876_v44 = vld [vmem:[%s2184_s7 + $0x74] ss:$28 sps:$4 sm:$0xff]   ;;  %v1878_v45 = vld [vmem:[%s2184_s7 + $0x7c] ss:$28 sps:$4 sm:$0xff]  }
  0x22   : > { %1558 = vmatpush3.bf16.msra.mxu0 %v1842_v14  ;;  %v1873_v41 = vld [vmem:[%s2184_s7 + $0x40] ss:$28 sps:$4 sm:$0xff]   ;;  %v1882_v46 = vld [vmem:[%s2566_s1 + $0x168] sm:$0xff]   ;;  %v1881_v49 = vld [vmem:[%s2184_s7 + $0x78] ss:$28 sps:$4 sm:$0xff]  }
  0x23   : > { %1622 = vmatpush3.bf16.msra.mxu1 %v1843_v15  ;;  %1559 = vmatprep.subr.bf16.mxu0 %v1844_v16  ;;  %v1883_v47 = vld [vmem:[%s2566_s1 + $0x128] sm:$0xff]   ;;  %v1886_v51 = vld [vmem:[%s2184_s7 + $0xb4] ss:$28 sps:$4 sm:$0xff]   ;;  %v1890_v52 = vld [vmem:[%s2566_s1 + $0x160] sm:$0xff]  }
  0x24   : > { %1623 = vmatprep.subr.bf16.mxu1 %v1845_v17  ;;  %v1880_v48 = vld [vmem:[%s2184_s7 + $0x70] ss:$28 sps:$4 sm:$0xff]   ;;  %v1891_v53 = vld [vmem:[%s2566_s1 + $0x120] sm:$0xff]   ;;  %v1898_v54 = vld [vmem:[%s2566_s1 + $0x158] sm:$0xff]  }
  0x25   : > { %v1884_v50 = vld [vmem:[%s2184_s7 + $0xac] ss:$28 sps:$4 sm:$0xff]   ;;  %v1899_v55 = vld [vmem:[%s2566_s1 + $0x118] sm:$0xff]   ;;  %v1892_v58 = vld [vmem:[%s2184_s7 + $0xe4] ss:$28 sps:$4 sm:$0xff]  }
  0x26   : > { %1560 = vmatpush3.bf16.msra.mxu0 %v1846_v18  ;;  %v1888_v56 = vld [vmem:[%s2184_s7 + $0xa8] ss:$28 sps:$4 sm:$0xff]   ;;  %v1889_v57 = vld [vmem:[%s2184_s7 + $0xb0] ss:$28 sps:$4 sm:$0xff]   ;;  %v1896_v62 = vld [vmem:[%s2184_s7 + $0xe0] ss:$28 sps:$4 sm:$0xff]  }
  0x27   : > { %1624 = vmatpush3.bf16.msra.mxu1 %v1847_v19  ;;  %1561 = vmatprep.subr.bf16.mxu0 %v1848_v20  ;;  %v1894_v59 = vld [vmem:[%s2184_s7 + $0xec] ss:$28 sps:$4 sm:$0xff]   ;;  %v1906_v60 = vld [vmem:[%s2566_s1 + $0x150] sm:$0xff]   ;;  %v1900_v2 = vld [vmem:[%s2184_s7 + $0x11c] ss:$28 sps:$4 sm:$0xff]  }
  0x28   : > { %1625 = vmatprep.subr.bf16.mxu1 %v1849_v21  ;;  %v1907_v61 = vld [vmem:[%s2566_s1 + $0x110] sm:$0xff]   ;;  %v1897_v63 = vld [vmem:[%s2184_s7 + $0xe8] ss:$28 sps:$4 sm:$0xff]   ;;  %v1905_v7 = vld [vmem:[%s2184_s7 + $0x120] ss:$28 sps:$4 sm:$0xff]  }
  0x29   : > { %v1914_v0 = vld [vmem:[%s2566_s1 + $0x148] sm:$0xff]   ;;  %v1902_v3 = vld [vmem:[%s2184_s7 + $0x124] ss:$28 sps:$4 sm:$0xff]   ;;  %v1904_v6 = vld [vmem:[%s2184_s7 + $0x118] ss:$28 sps:$4 sm:$0xff]  }
  0x2a   : > { %1562 = vmatpush3.bf16.msra.mxu0 %v1850_v22  ;;  %v1915_v1 = vld [vmem:[%s2566_s1 + $0x108] sm:$0xff]   ;;  %v1922_v4 = vld [vmem:[%s2566_s1 + $0x140] sm:$0xff]   ;;  %v1908_v9 = vld [vmem:[%s2184_s7 + $0x154] ss:$28 sps:$4 sm:$0xff]  }
  0x2b   : > { %1626 = vmatpush3.bf16.msra.mxu1 %v1851_v23  ;;  %1563 = vmatprep.subr.bf16.mxu0 %v1852_v24  ;;  %v1923_v5 = vld [vmem:[%s2566_s1 + $0x100] sm:$0xff]   ;;  %v1910_v10 = vld [vmem:[%s2184_s7 + $0x15c] ss:$28 sps:$4 sm:$0xff]   ;;  %v1912_v11 = vld [vmem:[%s2184_s7 + $0x150] ss:$28 sps:$4 sm:$0xff]  }
  0x2c   : > { %1627 = vmatprep.subr.bf16.mxu1 %v1853_v25  ;;  %v1930_v8 = vld [vmem:[%s2566_s1 + $0x180] sm:$0xff]   ;;  %v1913_v12 = vld [vmem:[%s2184_s7 + $0x158] ss:$28 sps:$4 sm:$0xff]   ;;  %v1916_v13 = vld [vmem:[%s2184_s7 + $0x18c] ss:$28 sps:$4 sm:$0xff]  }
  0x2d   : > { %v1918_v14 = vld [vmem:[%s2184_s7 + $0x194] ss:$28 sps:$4 sm:$0xff]   ;;  %v1920_v15 = vld [vmem:[%s2184_s7 + $0x188] ss:$28 sps:$4 sm:$0xff]   ;;  %v1927_v20 = vld [vmem:[%s2184_s7 + $0x160] ss:$28 sps:$4 sm:$0xff]  }
  0x2e   : > { %1564 = vmatpush3.bf16.msra.mxu0 %v1854_v26  ;;  %v1921_v16 = vld [vmem:[%s2184_s7 + $0x190] ss:$28 sps:$4 sm:$0xff]   ;;  %v1929_v18 = vld [vmem:[%s2184_s7 + $0x164] ss:$28 sps:$4 sm:$0xff]   ;;  %v1933_v22 = vld [vmem:[%s2184_s7 + $0x19c] ss:$28 sps:$4 sm:$0xff]  }
  0x2f   : > { %1628 = vmatpush3.bf16.msra.mxu1 %v1855_v27  ;;  %1565 = vmatprep.subr.bf16.mxu0 %v1856_v28  ;;  %v1926_v17 = vld [vmem:[%s2184_s7 + $0x14] ss:$28 sps:$4 sm:$0xff]   ;;  %v1931_v21 = vld [vmem:[%s2184_s7 + $0x4c] ss:$28 sps:$4 sm:$0xff]   ;;  %v1937_v25 = vld [vmem:[%s2184_s7 + $0x84] ss:$28 sps:$4 sm:$0xff]  }
  0x30   : > { %1629 = vmatprep.subr.bf16.mxu1 %v1857_v29  ;;  %v1924_v19 = vld [vmem:[%s2184_s7 + $0x10] ss:$28 sps:$4 sm:$0xff]   ;;  %v1935_v23 = vld [vmem:[%s2184_s7 + $0x48] ss:$28 sps:$4 sm:$0xff]   ;;  %v1936_v24 = vld [vmem:[%s2184_s7 + $0x198] ss:$28 sps:$4 sm:$0xff]  }
  0x31   : > { %v1939_v26 = vld [vmem:[%s2184_s7 + $0x18] ss:$28 sps:$4 sm:$0xff]   ;;  %v1940_v27 = vld [vmem:[%s2184_s7 + $0x80] ss:$28 sps:$4 sm:$0xff]   ;;  %v1941_v28 = vld [vmem:[%s2184_s7 + $0x50] ss:$28 sps:$4 sm:$0xff]  }
  0x32   : > { %1566 = vmatpush3.bf16.msra.mxu0 %v1858_v30  ;;  %v1942_v29 = vld [vmem:[%s2184_s7 + $0xbc] ss:$28 sps:$4 sm:$0xff]   ;;  %v1944_v30 = vld [vmem:[%s2184_s7 + $0x88] ss:$28 sps:$4 sm:$0xff]   ;;  %v1947_v33 = vld [vmem:[%s2184_s7 + $0xf4] ss:$28 sps:$4 sm:$0xff]  }
  0x33   : > { %1630 = vmatpush3.bf16.msra.mxu1 %v1859_v31  ;;  %1679 = vmatprep.subr.bf16.mxu0 %v1866_v36  ;;  %v1945_v31 = vld [vmem:[%s2184_s7 + $0xb8] ss:$28 sps:$4 sm:$0xff]   ;;  %v1950_v35 = vld [vmem:[%s2184_s7 + $0xf0] ss:$28 sps:$4 sm:$0xff]  }
  0x34   : > { %1770 = vmatprep.subr.bf16.mxu1 %v1866_v36  ;;  %v1951_v36 = vld [vmem:[%s2184_s7 + $0x130] ss:$28 sps:$4 sm:$0xff]  }
  0x35   : > { %977 = vmatmul.mubr.bf16.vlgmr.msra.gmra.mxu0 %v1860_v32  ;;  %v1946_v32 = vld [vmem:[%s2184_s7 + $0xc0] ss:$28 sps:$4 sm:$0xff]  }
  0x36   : > { %1074 = vmatmul.mubr.bf16.vlgmr.msra.gmra.mxu1 %v1863_v34  ;;  %1680 = vmatpush3.bf16.msra.mxu0 %v1867_v37  ;;  %v1949_v34 = vld [vmem:[%s2184_s7 + $0xf8] ss:$28 sps:$4 sm:$0xff]  }
  0x37   : > { %1778 = vmatpush3.bf16.msra.mxu1 %v1867_v37  ;;  %984 = vmatprep.mubr.bf16.mxu0 %v1868_v38  ;;  %v1952_v37 = vld [vmem:[%s2184_s7 + $0x12c] ss:$28 sps:$4 sm:$0xff]  }
  0x38   : > { %1081 = vmatprep.mubr.bf16.mxu1 %v1870_v39  ;;  %1681 = vmatprep.subr.bf16.mxu0 %v1874_v42  ;;  %v1954_v38 = vld [vmem:[%s2184_s7 + $0x168] ss:$28 sps:$4 sm:$0xff]  }
  0x39   : > { %1771 = vmatprep.subr.bf16.mxu1 %v1874_v42  ;;  %v1955_v39 = vld [vmem:[%s2184_s7 + $0x128] ss:$28 sps:$4 sm:$0xff]  }
  0x3a   : > { %1682 = vmatpush3.bf16.msra.mxu0 %v1875_v43 }
  0x3b   : > { %1779 = vmatpush3.bf16.msra.mxu1 %v1875_v43  ;;  %1683 = vmatprep.subr.bf16.mxu0 %v1882_v46  ;;  %v2310_v43 = vld [vmem:[%s2567_s2] ss:$0 sm:$0xff] }
  0x3c   : > { %1772 = vmatprep.subr.bf16.mxu1 %v1882_v46 }
  0x3d   : > { %985 = vmatmul.mubr.bf16.gmra.mxu0 %v1872_v40  ;;  %v1956_v40 = vld [vmem:[%s2184_s7 + $0x1a0] ss:$28 sps:$4 sm:$0xff]   ;;  %s164_s7 = sand.u32 1, %s2009_s13  }
  0x3e   : > { %1082 = vmatmul.mubr.bf16.gmra.mxu1 %v1873_v41  ;;  %992 = vmatprep.mubr.bf16.mxu0 %v1876_v44  ;;  %s1428_s24 = sshll.u32 %s164_s7, 7  ;;  %s2525_s16 = scalar_lea.sflag [#allocation3], %s164_s7 }
  0x3f   : > { %1089 = vmatprep.mubr.bf16.mxu1 %v1878_v45  ;;  %1684 = vmatpush3.bf16.msra.mxu0 %v1883_v47  ;;  %s2433_s25 = scalar_lea.vmem [#allocation2], %s1428_s24 }
  0x40   : > { %1780 = vmatpush3.bf16.msra.mxu1 %v1883_v47  ;;  %1685 = vmatprep.subr.bf16.mxu0 %v1890_v52  ;;  %s1362_s27 = sshll.u32 %s2433_s25, 4  ;;  %s2520_s27 = int_to_ptr.vmem [resolvable:$true] %s1362_s27 }
  0x41   : > { %1773 = vmatprep.subr.bf16.mxu1 %v1890_v52  ;;  %s1957_s4 = scalar_lea.vmem %s2520_s27, 2048  ;;  %p1964_p0 = scmp.lt.s32.totalorder %s2520_s27, %s1962_s9 }
  0x42   : > { %p1958_p11 = scmp.ne.s32.totalorder %s2520_s27, %s1957_s4  ;;  %p1965_p1 = scmp.lt.s32.totalorder %s1963_s6, %s1957_s4 }
  0x43   : > { %1686 = vmatpush3.bf16.msra.mxu0 %v1891_v53 }
  0x44   : > { %1781 = vmatpush3.bf16.msra.mxu1 %v1891_v53  ;;  %1687 = vmatprep.subr.bf16.mxu0 %v1898_v54  ;;  %p1959_p12 = pnand %p1958_p11, %p2080_p5  ;;  %p1966_p2 = por %p1965_p1, %p1964_p0 }
  0x45   : > { %993 = vmatmul.mubr.bf16.gmra.mxu0 %v1880_v48  ;;  %1774 = vmatprep.subr.bf16.mxu1 %v1898_v54 }
  0x46   : > { %1090 = vmatmul.mubr.bf16.gmra.mxu1 %v1881_v49  ;;  %1000 = vmatprep.mubr.bf16.mxu0 %v1884_v50  ;;  %p1960_p13 = pneg %p1959_p12 }
  0x47   : > { %1097 = vmatprep.mubr.bf16.mxu1 %v1886_v51  ;;  %1688 = vmatpush3.bf16.msra.mxu0 %v1899_v55 }
  0x48   : > { %1782 = vmatpush3.bf16.msra.mxu1 %v1899_v55  ;;  %1689 = vmatprep.subr.bf16.mxu0 %v1906_v60  ;;  %p1967_p3 = pnand %p1966_p2, %p1960_p13 }
  0x49   : > { %1775 = vmatprep.subr.bf16.mxu1 %v1906_v60 }
  0x4b   : > { %1690 = vmatpush3.bf16.msra.mxu0 %v1907_v61 }
  0x4c   : > { %1783 = vmatpush3.bf16.msra.mxu1 %v1907_v61  ;;  %1691 = vmatprep.subr.bf16.mxu0 %v1914_v0 }
  0x4d   : > { %1001 = vmatmul.mubr.bf16.gmra.mxu0 %v1888_v56  ;;  %1776 = vmatprep.subr.bf16.mxu1 %v1914_v0 }
  0x4e   : > { %1098 = vmatmul.mubr.bf16.gmra.mxu1 %v1889_v57  ;;  %1008 = vmatprep.mubr.bf16.mxu0 %v1892_v58 }
  0x4f   : > { %1105 = vmatprep.mubr.bf16.mxu1 %v1894_v59  ;;  %1692 = vmatpush3.bf16.msra.mxu0 %v1915_v1 }
  0x50   : > { %1784 = vmatpush3.bf16.msra.mxu1 %v1915_v1  ;;  %1693 = vmatprep.subr.bf16.mxu0 %v1922_v4 }
  0x51   : > { %1777 = vmatprep.subr.bf16.mxu1 %v1922_v4 }
  0x53   : > { %1694 = vmatpush3.bf16.msra.mxu0 %v1923_v5 }
  0x54   : > { %1785 = vmatpush3.bf16.msra.mxu1 %v1923_v5 }
  0x55   : > { %1009 = vmatmul.mubr.bf16.gmra.mxu0 %v1896_v62  ;;  %1752 = vmatprep.subr.bf16.mxu1 %v1930_v8 }
  0x56   : > { %1106 = vmatmul.mubr.bf16.gmra.mxu1 %v1897_v63  ;;  %1016 = vmatprep.mubr.bf16.mxu0 %v1900_v2 }
  0x57   : > { %1113 = vmatprep.mubr.bf16.mxu1 %v1902_v3 }
  0x5d   : > { %1017 = vmatmul.mubr.bf16.gmra.mxu0 %v1904_v6 }
  0x5e   : > { %1114 = vmatmul.mubr.bf16.gmra.mxu1 %v1905_v7  ;;  %1024 = vmatprep.mubr.bf16.mxu0 %v1908_v9 }
  0x5f   : > { %1121 = vmatprep.mubr.bf16.mxu1 %v1910_v10 }
  0x65   : > { %1025 = vmatmul.mubr.bf16.gmra.mxu0 %v1912_v11 }
  0x66   : > { %1122 = vmatmul.mubr.bf16.gmra.mxu1 %v1913_v12  ;;  %1032 = vmatprep.mubr.bf16.mxu0 %v1916_v13 }
  0x67   : > { %1129 = vmatprep.mubr.bf16.mxu1 %v1918_v14 }
  0x6d   : > { %1033 = vmatmul.mubr.bf16.gmra.mxu0 %v1920_v15 }
  0x6e   : > { %1130 = vmatmul.mubr.bf16.gmra.mxu1 %v1921_v16  ;;  %1170 = vmatprep.mubr.bf16.mxu0 %v1926_v17 }
  0x6f   : > { %1218 = vmatprep.mubr.bf16.mxu1 %v1929_v18 }
  0x75   : > { %1171 = vmatmul.mubr.bf16.vlgmr.msra.gmra.mxu0 %v1924_v19 }
  0x76   : > { %1219 = vmatmul.mubr.bf16.vlgmr.msra.gmra.mxu1 %v1927_v20  ;;  %1178 = vmatprep.mubr.bf16.mxu0 %v1931_v21 }
  0x77   : > { %1753 = vmatpush3.bf16.msra.mxu1 %v1930_v8  ;;  %1226 = vmatprep.mubr.bf16.mxu1 %v1933_v22 }
  0x7d   : > { %1179 = vmatmul.mubr.bf16.gmra.mxu0 %v1935_v23 }
  0x7e   : > { %1227 = vmatmul.mubr.bf16.gmra.mxu1 %v1936_v24  ;;  %1186 = vmatprep.mubr.bf16.mxu0 %v1937_v25 }
  0x7f   : > { %1754 = vmatprep.mubr.msk.bf16.mxu1 %vm919_vm0, %v1939_v26 }
  0x85   : > { %1187 = vmatmul.mubr.bf16.gmra.mxu0 %v1940_v27 }
  0x86   : > { %1755 = vmatmul.mubr.msk.bf16.vlgmr.msra.gmra.mxu1 %vm919_vm0, %v1941_v28  ;;  %1194 = vmatprep.mubr.bf16.mxu0 %v1942_v29 }
  0x87   : > { %1758 = vmatprep.mubr.msk.bf16.mxu1 %vm919_vm0, %v1944_v30 }
  0x8d   : > { %1195 = vmatmul.mubr.bf16.gmra.mxu0 %v1945_v31 }
  0x8e   : > { %1759 = vmatmul.mubr.msk.bf16.gmra.mxu1 %vm919_vm0, %v1946_v32  ;;  %1202 = vmatprep.mubr.bf16.mxu0 %v1947_v33 }
  0x8f   : > { %1762 = vmatprep.mubr.msk.bf16.mxu1 %vm919_vm0, %v1949_v34 }
  0x95   : > { %1203 = vmatmul.mubr.bf16.gmra.mxu0 %v1950_v35 }
  0x96   : > { %1763 = vmatmul.mubr.msk.bf16.gmra.mxu1 %vm919_vm0, %v1951_v36  ;;  %1210 = vmatprep.mubr.bf16.mxu0 %v1952_v37 }
  0x97   : > { %1766 = vmatprep.mubr.msk.bf16.mxu1 %vm919_vm0, %v1954_v38 }
  0x9d   : > { %1211 = vmatmul.mubr.bf16.gmra.mxu0 %v1955_v39 }
  0x9e   : > { %1767 = vmatmul.mubr.msk.bf16.gmra.mxu1 %vm919_vm0, %v1956_v40 }
  0xf5   : > { %v1567_v41 = vpop.f32.mrf.mxu0 }
  0xf6   : > { %v1631_v42 = vpop.f32.mrf.mxu1 }
  0xf7   : > { %v1568_v44 = vpop.f32.mrf.mxu0 }
  0xf8   : > { %v1569_v45 = vadd.f32 %v1568_v44, %v1567_v41  ;;  %v1632_v46 = vpop.f32.mrf.mxu1 }
  0xf9   : > { %v1633_v47 = vadd.f32 %v1632_v46, %v1631_v42  ;;  %v1570_v48 = vpop.f32.mrf.mxu0 }
  0xfa   : > { %v979_v49 = vadd.f32 %v1569_v45, %v2310_v43  ;;  %v1634_v50 = vpop.f32.mrf.mxu1 }
  0xfb   : > { %v1571_v51 = vpop.f32.mrf.mxu0 }
  0xfc   : > { %v2313_v52 = vadd.f32 %v1633_v47, %v979_v49  ;;  %v1572_v53 = vadd.f32 %v1571_v51, %v1570_v48  ;;  %v1635_v54 = vpop.f32.mrf.mxu1 }
  0xfd   : > { %v1636_v55 = vadd.f32 %v1635_v54, %v1634_v50  ;;  %v1573_v56 = vpop.f32.mrf.mxu0 }
  0xfe   : > { %v982_v57 = vadd.f32 %v1572_v53, %v2310_v43  ;;  %v1637_v58 = vpop.f32.mrf.mxu1 }
  0xff   : > { %v1574_v59 = vpop.f32.mrf.mxu0 }
 0x100   : > { %v2316_v60 = vadd.f32 %v1636_v55, %v982_v57  ;;  %v1575_v61 = vadd.f32 %v1574_v59, %v1573_v56  ;;  %v1638_v62 = vpop.f32.mrf.mxu1 }
 0x101   : > { %v1639_v63 = vadd.f32 %v1638_v62, %v1637_v58  ;;  %v1576_v0 = vpop.f32.mrf.mxu0 }
 0x102   : > { %v987_v1 = vadd.f32 %v1575_v61, %v2310_v43  ;;  %v1640_v2 = vpop.f32.mrf.mxu1 }
 0x103   : > { %v1577_v3 = vpop.f32.mrf.mxu0 }
 0x104   : > { %v2319_v4 = vadd.f32 %v1639_v63, %v987_v1  ;;  %v1578_v5 = vadd.f32 %v1577_v3, %v1576_v0  ;;  %v1641_v6 = vpop.f32.mrf.mxu1 }
 0x105   : > { %v1642_v7 = vadd.f32 %v1641_v6, %v1640_v2  ;;  %v1579_v8 = vpop.f32.mrf.mxu0 }
 0x106   : > { %v990_v9 = vadd.f32 %v1578_v5, %v2310_v43  ;;  %v1643_v10 = vpop.f32.mrf.mxu1 }
 0x107   : > { %v1580_v11 = vpop.f32.mrf.mxu0 }
 0x108   : > { %v2322_v12 = vadd.f32 %v1642_v7, %v990_v9  ;;  %v1581_v13 = vadd.f32 %v1580_v11, %v1579_v8  ;;  %v1644_v14 = vpop.f32.mrf.mxu1 }
 0x109   : > { %v1645_v15 = vadd.f32 %v1644_v14, %v1643_v10  ;;  %v1582_v16 = vpop.f32.mrf.mxu0 }
 0x10a   : > { %v995_v17 = vadd.f32 %v1581_v13, %v2310_v43  ;;  %v1646_v18 = vpop.f32.mrf.mxu1 }
 0x10b   : > { %v1583_v19 = vpop.f32.mrf.mxu0 }
 0x10c   : > { %v2325_v20 = vadd.f32 %v1645_v15, %v995_v17  ;;  %v1584_v21 = vadd.f32 %v1583_v19, %v1582_v16  ;;  %v1647_v22 = vpop.f32.mrf.mxu1 }
 0x10d   : > { %v1648_v23 = vadd.f32 %v1647_v22, %v1646_v18  ;;  %v2327_v24 = vpop.f32.mrf.mxu0 }
 0x10e   : > { %v998_v25 = vadd.f32 %v1584_v21, %v2310_v43  ;;  %v2330_v26 = vpop.f32.mrf.mxu1 }
 0x10f   : > { %v2332_v27 = vpop.f32.mrf.mxu0 }
 0x110   : > { %v2334_v28 = vadd.f32 %v1648_v23, %v998_v25  ;;  %v2336_v29 = vpop.f32.mrf.mxu1 }
 0x111   : > { %v2338_v30 = vpop.f32.mrf.mxu0 }
 0x112   : > { %v2340_v31 = vpop.f32.mrf.mxu1 }
 0x113   : > { %v2342_v32 = vpop.f32.mrf.mxu0 }
 0x114   : > { %v2344_v33 = vpop.f32.mrf.mxu1 }
 0x115   : > { %v2346_v34 = vpop.f32.mrf.mxu0 }
 0x116   : > { %v2348_v35 = vpop.f32.mrf.mxu1 }
 0x117   : > { %v2350_v36 = vpop.f32.mrf.mxu0 }
 0x118   : > { %v2352_v37 = vpop.f32.mrf.mxu1 }
 0x119   : > { %v2354_v38 = vpop.f32.mrf.mxu0 }
 0x11a   : > { %v2356_v39 = vpop.f32.mrf.mxu1 }
 0x11b   : > { %v2358_v40 = vpop.f32.mrf.mxu0 }
 0x11c   : > { %v2360_v41 = vpop.f32.mrf.mxu1 }
 0x11d   : > { %v2362_v42 = vpop.f32.mrf.mxu0 }
 0x11e   : > { %v2364_v44 = vpop.f32.mrf.mxu1 }
 0x11f   : > { %v2366_v45 = vpop.f32.mrf.mxu0 }
 0x120   : > { %v2368_v46 = vpop.f32.mrf.mxu1 }
 0x121   : > { %v2370_v47 = vpop.f32.mrf.mxu0 }
 0x122   : > { %v2372_v48 = vpop.f32.mrf.mxu1 }
 0x123   : > { %2571 = vst [vmem:[#allocation5_spill] sm:$0xff] %v2372_v48  ;;  %v2374_v49 = vpop.f32.mrf.mxu0 }
 0x124   : > { %2572 = vst [vmem:[#allocation6_spill] sm:$0xff] %v2374_v49  ;;  %v2376_v50 = vpop.f32.mrf.mxu1 }
 0x125   : > { %2573 = vst [vmem:[#allocation7_spill] sm:$0xff] %v2376_v50  ;;  %v2378_v51 = vpop.f32.mrf.mxu0 }
 0x126   : > { %v2380_v53 = vpop.f32.mrf.mxu1 }
 0x127   : > { %v2382_v54 = vpop.f32.mrf.mxu0 }
 0x128   : > { %v2384_v55 = vpop.f32.mrf.mxu1 }
 0x129   : > { %v2386_v56 = vpop.f32.mrf.mxu0 }
 0x12a   : > { %v2388_v57 = vpop.f32.mrf.mxu1 }
 0x12b   : > { %2574 = vst [vmem:[#allocation8_spill] sm:$0xff] %v2388_v57  ;;  %v2390_v58 = vpop.f32.mrf.mxu0 }
 0x12c   : > { %v2392_v59 = vpop.f32.mrf.mxu1 }
 0x12d   : > { %2575 = vst [vmem:[#allocation9_spill] sm:$0xff] %v2392_v59  ;;  %v2394_v61 = vpop.f32.mrf.mxu0 }
 0x12e   : > { %v2396_v62 = vpop.f32.mrf.mxu1 }
 0x12f   : > { %v2398_v63 = vpop.f32.mrf.mxu0 }
 0x130   : > { %v2400_v0 = vpop.f32.mrf.mxu1 }
 0x131   : > { %v2402_v1 = vpop.f32.mrf.mxu0 }
 0x132   : > { %v2404_v2 = vpop.f32.mrf.mxu1 }
 0x133   : > { %2576 = vst [vmem:[#allocation10_spill] sm:$0xff] %v2404_v2  ;;  %v2406_v3 = vpop.f32.mrf.mxu0 }
 0x134   : > { %v2408_v5 = vpop.f32.mrf.mxu1 }
 0x135   : > { %2577 = vst [vmem:[#allocation11_spill] sm:$0xff] %v2408_v5  ;;  %v1695_v6 = vpop.f32.mrf.mxu0 }
 0x136   : > { %v2410_v7 = vpop.f32.mrf.mxu1 }
 0x137   : > { %v1696_v8 = vpop.f32.mrf.mxu0 }
 0x138   : > { %v2412_v9 = vpop.f32.mrf.mxu1  ;;  %v1697_v23 = vadd.f32 %v1696_v8, %v1695_v6 }
 0x139   : > { %v1698_v10 = vpop.f32.mrf.mxu0 }
 0x13a   : > { %v2414_v11 = vpop.f32.mrf.mxu1  ;;  %v1173_v49 = vadd.f32 %v1697_v23, %v2313_v52 }
 0x13b   : > { %2578 = vst [vmem:[#allocation12_spill] sm:$0xff] %v2414_v11  ;;  %v1699_v13 = vpop.f32.mrf.mxu0 }
 0x13c   : > { %v2416_v14 = vpop.f32.mrf.mxu1  ;;  %v1700_v57 = vadd.f32 %v1699_v13, %v1698_v10 }
 0x13d   : > { %2579 = vst [vmem:[#allocation13_spill] sm:$0xff] %v2416_v14  ;;  %v1701_v15 = vpop.f32.mrf.mxu0 }
 0x13e   : > { %v2418_v16 = vpop.f32.mrf.mxu1  ;;  %v1176_v13 = vadd.f32 %v1700_v57, %v2316_v60 }
 0x13f   : > { %v1702_v17 = vpop.f32.mrf.mxu0 }
 0x140   : > { %v2420_v18 = vpop.f32.mrf.mxu1  ;;  %v1703_v19 = vadd.f32 %v1702_v17, %v1701_v15  ;;  %v1587_v15 = vadd.f32 %v2332_v27, %v2327_v24  ;;  %v1651_v27 = vadd.f32 %v2336_v29, %v2330_v26 }
 0x141   : > { %v1704_v21 = vpop.f32.mrf.mxu0 }
 0x142   : > { %v2423_v22 = vpop.f32.mrf.mxu1  ;;  %v1181_v14 = vadd.f32 %v1703_v19, %v2319_v4  ;;  %v1003_v24 = vadd.f32 %v1587_v15, %v2310_v43 }
 0x143   : > { %v1705_v25 = vpop.f32.mrf.mxu0 }
 0x144   : > { %v2427_v50 = vpop.f32.mrf.mxu1  ;;  %v1706_v48 = vadd.f32 %v1705_v25, %v1704_v21  ;;  %v1100_v21 = vadd.f32 %v1651_v27, %v1003_v24 }
 0x145   : > { %v1707_v11 = vpop.f32.mrf.mxu0 }
 0x146   : > { %v1756_v59 = vpop.f32.mrf.mxu1  ;;  %v1184_v4 = vadd.f32 %v1706_v48, %v2322_v12  ;;  %v1593_v48 = vadd.f32 %v2350_v36, %v2346_v34  ;;  %v1657_v34 = vadd.f32 %v2352_v37, %v2348_v35  ;;  %v1596_v36 = vadd.f32 %v2358_v40, %v2354_v38 }
 0x147   : > { %v1278_v5 = vadd.f32 %v1756_v59, %v1181_v14  ;;  %v1708_v2 = vpop.f32.mrf.mxu0 }
 0x148   : > { %v1269_v17 = vpop.f32.mrf.mxu1  ;;  %v1709_v59 = vadd.f32 %v1708_v2, %v1707_v11  ;;  %v1011_v15 = vadd.f32 %v1593_v48, %v2310_v43 }
 0x149   : > { %1334 = vst [vmem:[%s2433_s25 + $0x10] sm:$0xff] %v1278_v5  ;;  %v1270_v6 = vadd.f32 %v1269_v17, %v1173_v49  ;;  %v1710_v8 = vpop.f32.mrf.mxu0  ;;  %v1590_v5 = vadd.f32 %v2342_v32, %v2338_v30  ;;  %v1654_v30 = vadd.f32 %v2344_v33, %v2340_v31 }
 0x14a   : > { %v1757_v19 = vpop.f32.mrf.mxu1  ;;  %v1189_v57 = vadd.f32 %v1709_v59, %v2325_v20  ;;  %v1108_v40 = vadd.f32 %v1657_v34, %v1011_v15  ;;  %v2585_v15 = vld [vmem:[#allocation12_spill] sm:$0xff]  ;;  %v2586_v34 = vld [vmem:[#allocation13_spill] sm:$0xff] }
 0x14b   : > { %1332 = vst [vmem:[%s2433_s25] sm:$0xff] %v1270_v6  ;;  %v1281_v10 = vadd.f32 %v1757_v19, %v1184_v4  ;;  %v1711_v52 = vpop.f32.mrf.mxu0  ;;  %v1006_v26 = vadd.f32 %v1590_v5, %v2310_v43  ;;  %v1611_v6 = vadd.f32 %v2398_v63, %v2394_v61  ;;  %v1605_v4 = vadd.f32 %v2382_v54, %v2378_v51 }
 0x14c   : > { %v1272_v49 = vpop.f32.mrf.mxu1  ;;  %v1712_v11 = vadd.f32 %v1711_v52, %v1710_v8  ;;  %v1660_v61 = vadd.f32 %v2360_v41, %v2356_v39  ;;  %v1675_v54 = vadd.f32 %v2400_v0, %v2396_v62  ;;  %v1669_v41 = vadd.f32 %v2384_v55, %v2380_v53 }
 0x14d   : > { %1335 = vst [vmem:[%s2433_s25 + $0x18] sm:$0xff] %v1281_v10  ;;  %v1273_v14 = vadd.f32 %v1272_v49, %v1176_v13  ;;  %v1713_v12 = vpop.f32.mrf.mxu0  ;;  %v1103_v33 = vadd.f32 %v1654_v30, %v1006_v26  ;;  %v1014_v10 = vadd.f32 %v1596_v36, %v2310_v43  ;;  %v1035_v51 = vadd.f32 %v1611_v6, %v2310_v43  ;;  %v2583_v30 = vld [vmem:[#allocation8_spill] sm:$0xff] }
 0x14e   : > { %v1760_v2 = vpop.f32.mrf.mxu1  ;;  %v1192_v31 = vadd.f32 %v1712_v11, %v2334_v28  ;;  %v1599_v28 = vadd.f32 %v2366_v45, %v2362_v42  ;;  %v1614_v13 = vadd.f32 %v2406_v3, %v2402_v1  ;;  %v1027_v39 = vadd.f32 %v1605_v4, %v2310_v43 }
 0x14f   : > { %1333 = vst [vmem:[%s2433_s25 + $0x8] sm:$0xff] %v1273_v14  ;;  %v1714_v60 = vpop.f32.mrf.mxu0  ;;  %v1608_v42 = vadd.f32 %v2390_v58, %v2386_v56  ;;  %v1739_v45 = vadd.f32 %v2420_v18, %v2418_v16  ;;  %v1111_v0 = vadd.f32 %v1660_v61, %v1014_v10  ;;  %v1663_v1 = vadd.f32 %v2368_v46, %v2364_v44  ;;  %v2580_v16 = vld [vmem:[#allocation6_spill] sm:$0xff] }
 0x150   : > { %v1715_v29 = vadd.f32 %v1714_v60, %v1713_v12  ;;  %v1285_v23 = vpop.f32.mrf.mxu1  ;;  %v1019_v12 = vadd.f32 %v1599_v28, %v2310_v43  ;;  %v1132_v53 = vadd.f32 %v1675_v54, %v1035_v51  ;;  %v1038_v55 = vadd.f32 %v1614_v13, %v2310_v43  ;;  %v2581_v60 = vld [vmem:[#allocation10_spill] sm:$0xff] }
 0x151   : > { %v1286_v32 = vadd.f32 %v1285_v23, %v1189_v57  ;;  %v1716_v25 = vpop.f32.mrf.mxu0  ;;  %v1733_v56 = vadd.f32 %v2412_v9, %v2410_v7  ;;  %v1602_v18 = vadd.f32 %v2580_v16, %v2370_v47  ;;  %v1124_v48 = vadd.f32 %v1669_v41, %v1027_v39  ;;  %v2582_v57 = vld [vmem:[#allocation11_spill] sm:$0xff]  ;;  %v2584_v7 = vld [vmem:[#allocation9_spill] sm:$0xff] }
 0x152   : > { %v1197_v17 = vadd.f32 %v1715_v29, %v1100_v21  ;;  %v1761_v20 = vpop.f32.mrf.mxu1  ;;  %v1030_v46 = vadd.f32 %v1608_v42, %v2310_v43  ;;  %v1678_v21 = vadd.f32 %v2582_v57, %v2581_v60  ;;  %v1742_v26 = vadd.f32 %v2427_v50, %v2423_v22 }
 0x153   : > { %1336 = vst [vmem:[%s2433_s25 + $0x20] sm:$0xff] %v1286_v32  ;;  %v1717_v8 = vpop.f32.mrf.mxu0  ;;  %v1229_v23 = vadd.f32 %v1739_v45, %v1132_v53  ;;  %v1672_v9 = vadd.f32 %v2584_v7, %v2583_v30  ;;  %v1736_v36 = vadd.f32 %v2586_v34, %v2585_v15  ;;  %v1221_v6 = vadd.f32 %v1733_v56, %v1124_v48 }
 0x154   : > { %v1294_v19 = vadd.f32 %v1760_v2, %v1197_v17  ;;  %v1718_v35 = vadd.f32 %v1717_v8, %v1716_v25  ;;  %v1288_v37 = vpop.f32.mrf.mxu1  ;;  %v1135_v25 = vadd.f32 %v1678_v21, %v1038_v55  ;;  %v1116_v8 = vadd.f32 %v1663_v1, %v1019_v12 }
 0x155   : > { %v1289_v59 = vadd.f32 %v1288_v37, %v1192_v31  ;;  %v1719_v38 = vpop.f32.mrf.mxu0  ;;  %v1022_v50 = vadd.f32 %v1602_v18, %v2310_v43  ;;  %v1127_v4 = vadd.f32 %v1672_v9, %v1030_v46 }
 0x156   : > { %1338 = vst [vmem:[%s2433_s25 + $0x30] sm:$0xff] %v1294_v19  ;;  %v1200_v63 = vadd.f32 %v1718_v35, %v1103_v33  ;;  %v2467_v52 = vpop.f32.mrf.mxu1  ;;  %v1232_v37 = vadd.f32 %v1742_v26, %v1135_v25 }
 0x157   : > { %1337 = vst [vmem:[%s2433_s25 + $0x28] sm:$0xff] %v1289_v59  ;;  %v1720_v24 = vpop.f32.mrf.mxu0  ;;  %v2587_v59 = vld [vmem:[#allocation5_spill] sm:$0xff]  ;;  %v1224_v28 = vadd.f32 %v1736_v36, %v1127_v4 }
 0x158   : > { %v1297_v27 = vadd.f32 %v1761_v20, %v1200_v63  ;;  %v1721_v5 = vadd.f32 %v1720_v24, %v1719_v38  ;;  %v1301_v49 = vpop.f32.mrf.mxu1  ;;  %v2588_v38 = vld [vmem:[#allocation7_spill] sm:$0xff] }
 0x159   : > { %v1722_v62 = vpop.f32.mrf.mxu0 }
 0x15a   : > { %1339 = vst [vmem:[%s2433_s25 + $0x38] sm:$0xff] %v1297_v27  ;;  %v1205_v3 = vadd.f32 %v1721_v5, %v1108_v40  ;;  %v1765_v14 = vpop.f32.mrf.mxu1  ;;  %v1666_v40 = vadd.f32 %v2588_v38, %v2587_v59 }
 0x15b   : > { %v1723_v58 = vpop.f32.mrf.mxu0 }
 0x15c   : > { %v1302_v2 = vadd.f32 %v1301_v49, %v1205_v3  ;;  %v1724_v11 = vadd.f32 %v1723_v58, %v1722_v62  ;;  %v1304_v44 = vpop.f32.mrf.mxu1  ;;  %v1119_v51 = vadd.f32 %v1666_v40, %v1022_v50 }
 0x15d   : > { %v1725_v29 = vpop.f32.mrf.mxu0 }
 0x15e   : > { %1340 = vst [vmem:[%s2433_s25 + $0x40] sm:$0xff] %v1302_v2  ;;  %v1208_v47 = vadd.f32 %v1724_v11, %v1111_v0  ;;  %v1768_v32 = vpop.f32.mrf.mxu1 }
 0x15f   : > { %v1326_v17 = vadd.f32 %v1768_v32, %v1229_v23  ;;  %v1726_v20 = vpop.f32.mrf.mxu0 }
 0x160   : > { %v1305_v22 = vadd.f32 %v1304_v44, %v1208_v47  ;;  %v1727_v31 = vadd.f32 %v1726_v20, %v1725_v29  ;;  %v1317_v33 = vpop.f32.mrf.mxu1 }
 0x161   : > { %1346 = vst [vmem:[%s2433_s25 + $0x70] sm:$0xff] %v1326_v17  ;;  %v1318_v19 = vadd.f32 %v1317_v33, %v1221_v6  ;;  %v1728_v35 = vpop.f32.mrf.mxu0 }
 0x162   : > { %1341 = vst [vmem:[%s2433_s25 + $0x48] sm:$0xff] %v1305_v22  ;;  %v1213_v10 = vadd.f32 %v1727_v31, %v1116_v8  ;;  %v1769_v61 = vpop.f32.mrf.mxu1 }
 0x163   : > { %1344 = vst [vmem:[%s2433_s25 + $0x60] sm:$0xff] %v1318_v19  ;;  %v1329_v43 = vadd.f32 %v1769_v61, %v1232_v37  ;;  %v1729_v63 = vpop.f32.mrf.mxu0 }
 0x164   : > { %v1310_v54 = vadd.f32 %v2467_v52, %v1213_v10  ;;  %v1730_v13 = vadd.f32 %v1729_v63, %v1728_v35  ;;  %v1320_v24 = vpop.f32.mrf.mxu1 }
 0x165   : > { %1347 = vst [vmem:[%s2433_s25 + $0x78] sm:$0xff] %v1329_v43  ;;  %v1321_v39 = vadd.f32 %v1320_v24, %v1224_v28 }
 0x166   : > { %1342 = vst [vmem:[%s2433_s25 + $0x50] sm:$0xff] %v1310_v54  ;;  %v1216_v41 = vadd.f32 %v1730_v13, %v1119_v51 }
 0x167   : > { %1345 = vst [vmem:[%s2433_s25 + $0x68] sm:$0xff] %v1321_v39 }
 0x168   : > { %v1313_v52 = vadd.f32 %v1765_v14, %v1216_v41 }
 0x16a   : > { %1343 = vst [vmem:[%s2433_s25 + $0x58] sm:$0xff] %v1313_v52 }
 0x16b   : > { %1970 = shalt.err (!%p1967_p3)
}
 0x16c   : > { %s1971_s8 = scalar_lea.hbm %s2518_s30, 2048  ;;  %s1975_s17 = scalar_lea.hbm %s2568_s3, 4096 }
 0x16d   : > { %p1972_p4 = scmp.ne.s32.totalorder %s2518_s30, %s1971_s8  ;;  %p1976_p9 = scmp.lt.s32.totalorder %s2518_s30, %s2568_s3 }
 0x16e   : > { %p1977_p10 = scmp.lt.s32.totalorder %s1975_s17, %s1971_s8 }
 0x16f   : > { %p1973_p7 = pnand %p1972_p4, %p2080_p5 }
 0x170   : > { %p1978_p11 = por %p1977_p10, %p1976_p9 }
 0x171   : > { %p1974_p8 = pneg %p1973_p7 }
 0x173   : > { %p1979_p12 = pnand %p1978_p11, %p1974_p8 }
 0x175   : > { %1982 = shalt.err (!%p1979_p12)
}
 0x176   : > { %s2020_s7 = smov 128   ;;  %s2021_s24 = smov 8  }
 0x177   : > { %1787 = dma.vmem_to_hbm [thread:$0]  (%p2080_p5), %s2520_s27, 2048, %s2518_s30, %s2525_s16, %s2020_s7, %s2020_s7, %s2021_s24  }
 0x178 PF: > { %p1793_p13 = scmp.ge.s32.totalorder %s2017_s15, 2  ;;  %s1377_s25 = sand.u32 1, %s2005_s12  }
 0x179   : > { %s1378_s26 = scalar_lea.sflag [#allocation3], %s1377_s25 }
 0x17a   : > { %p1790_p0 = pnand %p1793_p13, %p2084_p6 }
 0x17c   : > { %p1791_p1 = pneg %p1790_p0 }
 0x17e   : > { %2000 = dma.done.wait (%p1791_p1), %s1378_s26, 2048  }
 0x17f   : > { %2002 = vsyncadd (%p1791_p1), %s1378_s26, 4294965248  ;;  %p13_p2 = scmp.ge.s32.totalorder %s2067_s18, 4   ;;  %s2589_s12 = smov %s2009_s13 }
 0x180   : > { %s2590_s13 = smov %s2013_s14  ;;  %s2591_s14 = smov %s2078_s21 }
 0x181   : > { %s2592_s15 = smov %s2067_s18  ;;  %15 = sbr.rel (!%p13_p2) target bundleno = 3 (0x3), region = 67 }
 0x186   :  { %1383 = vsyncpa [#allocation3], 1 }
 0x187   :  { %1385 = vsyncpa [#allocation3 + $0x1], 1 }

</bundles_post_ra>
